<compile_context>
chip_gen: v5e
topology: v5e:2x2
jax: 0.10.0
libtpu: 0.0.40
codegen_flags: <defaults>
</compile_context>

<pallas_src>
import jax
import jax.numpy as jnp
from jax import lax
from jax.experimental import pallas as pl
from jax.experimental.pallas import tpu as pltpu

M = 3                  # number of branches
KSIZES = (3, 5, 7)     # kernel_size = 3 + 2*i
MAXPAD = 3             # padding = 1 + i, max over branches
FOOT = 2 * MAXPAD + 1  # 7-row / 7-col shared tap footprint


def _sk_kernel(x_ref, wtoep_ref, scale_ref, bias_ref, fcw_ref, fcb_ref,
               fcs_ref, fcsb_ref, tile_ref, out_ref, xpad_scr):
    # x_ref     : (NB, H, W*C) f32 input block (lane dim = W*C)
    # wtoep_ref : (FOOT, W*C, M*W*C) bf16 block-Toeplitz conv weights
    #             (horizontal taps + horizontal zero padding + branches folded in)
    # scale_ref : (1, M*W*C) folded BN scale, tiled over w
    # bias_ref  : (1, M*W*C) folded BN shift + conv bias, tiled over w
    # fcw_ref   : (W*C, d)  fc weight pre-tiled over w and pre-divided by H*W (GAP fold)
    # fcb_ref   : (1, d)
    # fcs_ref   : (d, M*C) concatenated branch fcs weights ; fcsb_ref : (1, M*C)
    # tile_ref  : (M*C, M*W*C) 0/1 matrix spreading per-channel attention over w
    # out_ref   : (NB, H, W*C)
    # xpad_scr  : (NB, H + 2*MAXPAD, W*C) bf16 row-padded input scratch
    NB, H, WC = out_ref.shape
    Hp = xpad_scr.shape[1]
    C = fcsb_ref.shape[1] // M
    MWC = M * WC
    rows = NB * H

    # ---- in-kernel row padding: zero only the border rows -------------------
    # Re-done every grid step: with "parallel" sharding a core may never see
    # program_id == 0, so a one-time init would be unsafe.
    zrows = jnp.zeros((NB, MAXPAD, WC), jnp.bfloat16)
    xpad_scr[:, 0:MAXPAD, :] = zrows
    xpad_scr[:, MAXPAD + H:Hp, :] = zrows
    xpad_scr[:, MAXPAD:MAXPAD + H, :] = x_ref[...].astype(jnp.bfloat16)

    # ---- branch convolutions: one long-K / wide-N matmul per vertical tap ---
    # acc[(b,h), i*W*C + w*C + co] = branch-i conv output; lives in registers,
    # so there is no per-offset accumulator read-modify-write through VMEM.
    acc = None
    for dh in range(FOOT):
        slab = xpad_scr[:, dh:dh + H, :].reshape(rows, WC)             # bf16
        part = jnp.dot(slab, wtoep_ref[dh],
                       preferred_element_type=jnp.float32)             # (rows, M*W*C)
        acc = part if acc is None else acc + part

    # ---- fused BN + ReLU for all branches at once ----------------------------
    feat = jnp.maximum(acc * scale_ref[...] + bias_ref[...], 0.0)       # (rows, M*W*C)

    # ---- GAP -> fc -> fcs -> softmax, vectorized over the NB images ----------
    fea_u = feat[:, 0:WC] + feat[:, WC:2 * WC] + feat[:, 2 * WC:3 * WC]
    hsum = jnp.sum(fea_u.reshape(NB, H, WC), axis=1)                    # (NB, W*C)
    fea_z = jnp.dot(hsum, fcw_ref[...],
                    preferred_element_type=jnp.float32) + fcb_ref[...]  # (NB, d)
    att = jnp.dot(fea_z, fcs_ref[...],
                  preferred_element_type=jnp.float32) + fcsb_ref[...]   # (NB, M*C)

    a0, a1, a2 = att[:, 0:C], att[:, C:2 * C], att[:, 2 * C:3 * C]
    mx = jnp.maximum(jnp.maximum(a0, a1), a2)                           # softmax over branches
    e0, e1, e2 = jnp.exp(a0 - mx), jnp.exp(a1 - mx), jnp.exp(a2 - mx)
    den = e0 + e1 + e2
    att_sm = jnp.concatenate([e0 / den, e1 / den, e2 / den], axis=1)    # (NB, M*C)

    # Spread per-channel attention over the w lanes and take the weighted branch sum.
    att_lane = jnp.dot(att_sm, tile_ref[...],
                       preferred_element_type=jnp.float32)              # (NB, M*W*C)
    weighted = feat.reshape(NB, H, MWC) * att_lane[:, None, :]
    fea_v = (weighted[..., 0:WC] + weighted[..., WC:2 * WC]
             + weighted[..., 2 * WC:3 * WC])                            # (NB, H, W*C)
    out_ref[...] = fea_v.astype(out_ref.dtype)


def sk_conv(x, params):
    """x: (N, H, W, C) NHWC float32 (channels-last view of the NCHW input)."""
    N, H, W, C = x.shape
    Hp = H + 2 * MAXPAD
    WC = W * C
    d = params["fc_w"].shape[1]

    # Keep >= 2 grid steps whenever N >= 2 (v7x has 2 TensorCores); otherwise pick
    # the largest image block that divides N to amortize per-step overhead.
    NB = 1
    for cand in (8, 4, 2):
        if N % cand == 0 and N // cand >= 2:
            NB = cand
            break

    # ---- derived / folded parameters (built once, wrapper-side) --------------
    # Block-Toeplitz conv weights: for each vertical tap dh, fold the horizontal
    # taps, the horizontal zero padding and all three branches into one
    # (W*C, M*W*C) matrix. Out-of-image horizontal taps simply get zero weight.
    sel = (jnp.arange(W)[None, :, None] + MAXPAD
           == jnp.arange(W)[None, None, :] + jnp.arange(FOOT)[:, None, None])
    sel = sel.astype(jnp.float32)                                    # (FOOT, W, W)
    toep = []
    for i, wk in enumerate((params["w0"], params["w1"], params["w2"])):
        off = MAXPAD - (1 + i)                                       # branch footprint offset
        wf = jnp.pad(wk, ((off, off), (off, off), (0, 0), (0, 0)))   # (FOOT, FOOT, C, C)
        t = jnp.einsum("dpw,hdio->hpiwo", sel, wf)                   # (FOOT, W, C, W, C)
        toep.append(t.reshape(FOOT, WC, WC))
    wtoep = jnp.concatenate(toep, axis=-1).astype(jnp.bfloat16)      # (FOOT, W*C, M*W*C)

    scale_lane = jnp.tile(params["scale"][:, None, :], (1, W, 1)).reshape(1, M * WC)
    bias_lane = jnp.tile(params["bias"][:, None, :], (1, W, 1)).reshape(1, M * WC)
    fcw_fold = jnp.tile(params["fc_w"], (W, 1)) / float(H * W)       # GAP folded into fc
    fcs_cat = jnp.transpose(params["fcs_w"], (1, 0, 2)).reshape(d, M * C)
    fcsb_cat = params["fcs_b"].reshape(1, M * C)
    tile_mat = jnp.kron(jnp.eye(M, dtype=jnp.float32),
                        jnp.tile(jnp.eye(C, dtype=jnp.float32), (1, W)))  # (M*C, M*W*C)

    x2 = x.reshape(N, H, WC)

    def full_spec(a):
        nd = a.ndim
        return pl.BlockSpec(a.shape, lambda n, _nd=nd: (0,) * _nd)

    grid_spec = pltpu.PrefetchScalarGridSpec(
        num_scalar_prefetch=0,
        grid=(N // NB,),
        in_specs=[
            pl.BlockSpec((NB, H, WC), lambda n: (n, 0, 0)),
            full_spec(wtoep), full_spec(scale_lane), full_spec(bias_lane),
            full_spec(fcw_fold), full_spec(params["fc_b"]),
            full_spec(fcs_cat), full_spec(fcsb_cat), full_spec(tile_mat),
        ],
        out_specs=pl.BlockSpec((NB, H, WC), lambda n: (n, 0, 0)),
        scratch_shapes=[pltpu.VMEM((NB, Hp, WC), jnp.bfloat16)],
    )
    out2 = pl.pallas_call(
        _sk_kernel,
        out_shape=jax.ShapeDtypeStruct((N, H, WC), x.dtype),
        grid_spec=grid_spec,
        # VMEM need here is well under 1 MiB -> keep the default scoped limit
        # (fits every generation, including v7x's 64 MiB physical VMEM).
        compiler_params=pltpu.CompilerParams(
            dimension_semantics=("parallel",)),
    )(x2, wtoep, scale_lane, bias_lane, fcw_fold, params["fc_b"],
      fcs_cat, fcsb_cat, tile_mat)
    return out2.reshape(N, H, W, C)


def init_params(key, in_ch, d):
    keys = jax.random.split(key, 12)

    def nrm(k, shape, s=0.1):
        return s * jax.random.normal(k, shape, jnp.float32)

    w0 = nrm(keys[0], (3, 3, in_ch, in_ch))
    w1 = nrm(keys[1], (5, 5, in_ch, in_ch))
    w2 = nrm(keys[2], (7, 7, in_ch, in_ch))
    conv_b = nrm(keys[3], (M, in_ch))
    gamma = 1.0 + nrm(keys[4], (M, in_ch))
    beta = nrm(keys[5], (M, in_ch))
    run_mean = nrm(keys[6], (M, in_ch))
    run_var = jnp.abs(nrm(keys[7], (M, in_ch))) + 1.0
    eps = 1e-5
    scale = gamma / jnp.sqrt(run_var + eps)          # folded BN scale
    bias = beta + (conv_b - run_mean) * scale        # folded BN shift + conv bias
    return dict(
        w0=w0, w1=w1, w2=w2, scale=scale, bias=bias,
        fc_w=nrm(keys[8], (in_ch, d)),
        fc_b=nrm(keys[9], (1, d)),
        fcs_w=nrm(keys[10], (M, d, in_ch)),
        fcs_b=nrm(keys[11], (M, in_ch)),
    )


def sk_conv_ref(x, params):
    """Pure-JAX reference with identical semantics and precision policy
    (bf16 conv operands, f32 accumulation / epilogue) for validation."""
    xb = x.astype(jnp.bfloat16)
    ws = [params["w0"].astype(jnp.bfloat16),
          params["w1"].astype(jnp.bfloat16),
          params["w2"].astype(jnp.bfloat16)]
    feas = []
    for i in range(M):
        pad = 1 + i
        y = lax.conv_general_dilated(
            xb, ws[i], window_strides=(1, 1),
            padding=[(pad, pad), (pad, pad)],
            dimension_numbers=("NHWC", "HWIO", "NHWC"),
            preferred_element_type=jnp.float32)
        y = y * params["scale"][i] + params["bias"][i]
        feas.append(jnp.maximum(y, 0.0))
    feas = jnp.stack(feas, axis=1)                        # (N, M, H, W, C)
    fea_u = feas.sum(axis=1)
    fea_s = fea_u.mean(axis=(1, 2))                       # (N, C)
    fea_z = fea_s @ params["fc_w"] + params["fc_b"]       # (N, d)
    att = jnp.stack([fea_z @ params["fcs_w"][i] + params["fcs_b"][i]
                     for i in range(M)], axis=1)          # (N, M, C)
    att = jax.nn.softmax(att, axis=1)
    return (feas * att[:, :, None, None, :]).sum(axis=1)


if __name__ == "__main__":
    N, C, H, W = 2, 4, 16, 16                  # NCHW reference shape (2, 4, 16, 16)
    d = max(C // 4, 32)                        # d = max(in_ch / r, L) with r=4, L=32
    key = jax.random.PRNGKey(0)
    kx, kp = jax.random.split(key)
    x = jax.random.normal(kx, (N, H, W, C), jnp.float32)   # NHWC layout of the input
    params = init_params(kp, C, d)

    out = jax.block_until_ready(sk_conv(x, params))
    ref = sk_conv_ref(x, params)
    assert out.shape == (N, H, W, C)
    err = float(jnp.max(jnp.abs(out - ref)))
    # bf16 MXU operands are bit-identical on both paths; residual error is f32
    # reassociation only (Toeplitz conv tap order, folded GAP/fc), so 2e-3 gives
    # comfortable margin at these shapes.
    assert err < 2e-3, f"max abs error {err}"
    print("KERNEL_OK")
</pallas_src>

<mosaic_0001>
module attributes {stable_mosaic.version = 11 : i64} {
  func.func @_sk_kernel(%arg0: i32, %arg1: memref<1x16x64xf32, #tpu.memory_space<vmem>>, %arg2: memref<7x64x192xbf16, #tpu.memory_space<vmem>>, %arg3: memref<1x192xf32, #tpu.memory_space<vmem>>, %arg4: memref<1x192xf32, #tpu.memory_space<vmem>>, %arg5: memref<64x32xf32, #tpu.memory_space<vmem>>, %arg6: memref<1x32xf32, #tpu.memory_space<vmem>>, %arg7: memref<32x12xf32, #tpu.memory_space<vmem>>, %arg8: memref<1x12xf32, #tpu.memory_space<vmem>>, %arg9: memref<12x192xf32, #tpu.memory_space<vmem>>, %arg10: memref<1x16x64xf32, #tpu.memory_space<vmem>>, %arg11: memref<1x22x64xbf16, #tpu.memory_space<vmem>>) attributes {dimension_semantics = [#tpu.dimension_semantics<parallel>], iteration_bounds = array<i64: 2>, scalar_prefetch = 0 : i64, scratch_operands = 1 : i64, tpu.core_type = #tpu.core_type<tc>, window_params = [{transform_indices = @transform_0, window_bounds = array<i64: 1, 16, 64>}, {pipeline_mode = #tpu.pipeline_mode<synchronous>, transform_indices = @transform_1, window_bounds = array<i64: 7, 64, 192>}, {pipeline_mode = #tpu.pipeline_mode<synchronous>, transform_indices = @transform_2, window_bounds = array<i64: 1, 192>}, {pipeline_mode = #tpu.pipeline_mode<synchronous>, transform_indices = @transform_3, window_bounds = array<i64: 1, 192>}, {pipeline_mode = #tpu.pipeline_mode<synchronous>, transform_indices = @transform_4, window_bounds = array<i64: 64, 32>}, {pipeline_mode = #tpu.pipeline_mode<synchronous>, transform_indices = @transform_5, window_bounds = array<i64: 1, 32>}, {pipeline_mode = #tpu.pipeline_mode<synchronous>, transform_indices = @transform_6, window_bounds = array<i64: 32, 12>}, {pipeline_mode = #tpu.pipeline_mode<synchronous>, transform_indices = @transform_7, window_bounds = array<i64: 1, 12>}, {pipeline_mode = #tpu.pipeline_mode<synchronous>, transform_indices = @transform_8, window_bounds = array<i64: 12, 192>}, {transform_indices = @transform_9, window_bounds = array<i64: 1, 16, 64>}]} {
    %cst = arith.constant 0.000000e+00 : bf16
    %0 = vector.broadcast %cst : bf16 to vector<1x3x64xbf16>
    %c0 = arith.constant 0 : index
    %c0_0 = arith.constant 0 : index
    %c0_1 = arith.constant 0 : index
    %1 = vector.load %arg11[%c0, %c0_0, %c0_1] : memref<1x22x64xbf16, #tpu.memory_space<vmem>>, vector<1x3x64xbf16>
    tpu.vector_store %arg11[%c0, %c0_0, %c0_1], %0 {strides = array<i32>} : memref<1x22x64xbf16, #tpu.memory_space<vmem>>, vector<1x3x64xbf16>,
    %c0_2 = arith.constant 0 : index
    %c19 = arith.constant 19 : index
    %c0_3 = arith.constant 0 : index
    %2 = vector.load %arg11[%c0_2, %c19, %c0_3] : memref<1x22x64xbf16, #tpu.memory_space<vmem>>, vector<1x3x64xbf16>
    tpu.vector_store %arg11[%c0_2, %c19, %c0_3], %0 {strides = array<i32>} : memref<1x22x64xbf16, #tpu.memory_space<vmem>>, vector<1x3x64xbf16>,
    %c0_4 = arith.constant 0 : index
    %c0_5 = arith.constant 0 : index
    %c0_6 = arith.constant 0 : index
    %3 = vector.load %arg1[%c0_4, %c0_5, %c0_6] : memref<1x16x64xf32, #tpu.memory_space<vmem>>, vector<1x16x64xf32>
    %4 = arith.truncf %3 : vector<1x16x64xf32> to vector<1x16x64xbf16>
    %c0_7 = arith.constant 0 : index
    %c3 = arith.constant 3 : index
    %c0_8 = arith.constant 0 : index
    %5 = vector.load %arg11[%c0_7, %c3, %c0_8] : memref<1x22x64xbf16, #tpu.memory_space<vmem>>, vector<1x16x64xbf16>
    tpu.vector_store %arg11[%c0_7, %c3, %c0_8], %4 {strides = array<i32>} : memref<1x22x64xbf16, #tpu.memory_space<vmem>>, vector<1x16x64xbf16>,
    %c0_9 = arith.constant 0 : index
    %c0_10 = arith.constant 0 : index
    %c0_11 = arith.constant 0 : index
    %6 = vector.load %arg11[%c0_9, %c0_10, %c0_11] : memref<1x22x64xbf16, #tpu.memory_space<vmem>>, vector<1x16x64xbf16>
    %7 = vector.shape_cast %6 : vector<1x16x64xbf16> to vector<16x64xbf16>
    %c0_12 = arith.constant 0 : index
    %c0_13 = arith.constant 0 : index
    %c0_14 = arith.constant 0 : index
    %8 = vector.load %arg2[%c0_12, %c0_13, %c0_14] : memref<7x64x192xbf16, #tpu.memory_space<vmem>>, vector<1x64x192xbf16>
    %9 = vector.shape_cast %8 : vector<1x64x192xbf16> to vector<64x192xbf16>
    %cst_15 = arith.constant dense<0.000000e+00> : vector<16x192xf32>
    %10 = tpu.matmul %7, %9, %cst_15 {dimension_numbers = #tpu.dot_dimension_numbers<[1], [0], [0], [1], [0, 0, 1, 1], [], []>} : vector<16x64xbf16>, vector<64x192xbf16>, vector<16x192xf32> -> vector<16x192xf32>
    %c0_16 = arith.constant 0 : index
    %c1 = arith.constant 1 : index
    %c0_17 = arith.constant 0 : index
    %11 = vector.load %arg11[%c0_16, %c1, %c0_17] : memref<1x22x64xbf16, #tpu.memory_space<vmem>>, vector<1x16x64xbf16>
    %12 = vector.shape_cast %11 : vector<1x16x64xbf16> to vector<16x64xbf16>
    %c1_18 = arith.constant 1 : index
    %c0_19 = arith.constant 0 : index
    %c0_20 = arith.constant 0 : index
    %13 = vector.load %arg2[%c1_18, %c0_19, %c0_20] : memref<7x64x192xbf16, #tpu.memory_space<vmem>>, vector<1x64x192xbf16>
    %14 = vector.shape_cast %13 : vector<1x64x192xbf16> to vector<64x192xbf16>
    %cst_21 = arith.constant dense<0.000000e+00> : vector<16x192xf32>
    %15 = tpu.matmul %12, %14, %cst_21 {dimension_numbers = #tpu.dot_dimension_numbers<[1], [0], [0], [1], [0, 0, 1, 1], [], []>} : vector<16x64xbf16>, vector<64x192xbf16>, vector<16x192xf32> -> vector<16x192xf32>
    %16 = arith.addf %10, %15 : vector<16x192xf32>
    %c0_22 = arith.constant 0 : index
    %c2 = arith.constant 2 : index
    %c0_23 = arith.constant 0 : index
    %17 = vector.load %arg11[%c0_22, %c2, %c0_23] : memref<1x22x64xbf16, #tpu.memory_space<vmem>>, vector<1x16x64xbf16>
    %18 = vector.shape_cast %17 : vector<1x16x64xbf16> to vector<16x64xbf16>
    %c2_24 = arith.constant 2 : index
    %c0_25 = arith.constant 0 : index
    %c0_26 = arith.constant 0 : index
    %19 = vector.load %arg2[%c2_24, %c0_25, %c0_26] : memref<7x64x192xbf16, #tpu.memory_space<vmem>>, vector<1x64x192xbf16>
    %20 = vector.shape_cast %19 : vector<1x64x192xbf16> to vector<64x192xbf16>
    %cst_27 = arith.constant dense<0.000000e+00> : vector<16x192xf32>
    %21 = tpu.matmul %18, %20, %cst_27 {dimension_numbers = #tpu.dot_dimension_numbers<[1], [0], [0], [1], [0, 0, 1, 1], [], []>} : vector<16x64xbf16>, vector<64x192xbf16>, vector<16x192xf32> -> vector<16x192xf32>
    %22 = arith.addf %16, %21 : vector<16x192xf32>
    %c0_28 = arith.constant 0 : index
    %c3_29 = arith.constant 3 : index
    %c0_30 = arith.constant 0 : index
    %23 = vector.load %arg11[%c0_28, %c3_29, %c0_30] : memref<1x22x64xbf16, #tpu.memory_space<vmem>>, vector<1x16x64xbf16>
    %24 = vector.shape_cast %23 : vector<1x16x64xbf16> to vector<16x64xbf16>
    %c3_31 = arith.constant 3 : index
    %c0_32 = arith.constant 0 : index
    %c0_33 = arith.constant 0 : index
    %25 = vector.load %arg2[%c3_31, %c0_32, %c0_33] : memref<7x64x192xbf16, #tpu.memory_space<vmem>>, vector<1x64x192xbf16>
    %26 = vector.shape_cast %25 : vector<1x64x192xbf16> to vector<64x192xbf16>
    %cst_34 = arith.constant dense<0.000000e+00> : vector<16x192xf32>
    %27 = tpu.matmul %24, %26, %cst_34 {dimension_numbers = #tpu.dot_dimension_numbers<[1], [0], [0], [1], [0, 0, 1, 1], [], []>} : vector<16x64xbf16>, vector<64x192xbf16>, vector<16x192xf32> -> vector<16x192xf32>
    %28 = arith.addf %22, %27 : vector<16x192xf32>
    %c0_35 = arith.constant 0 : index
    %c4 = arith.constant 4 : index
    %c0_36 = arith.constant 0 : index
    %29 = vector.load %arg11[%c0_35, %c4, %c0_36] : memref<1x22x64xbf16, #tpu.memory_space<vmem>>, vector<1x16x64xbf16>
    %30 = vector.shape_cast %29 : vector<1x16x64xbf16> to vector<16x64xbf16>
    %c4_37 = arith.constant 4 : index
    %c0_38 = arith.constant 0 : index
    %c0_39 = arith.constant 0 : index
    %31 = vector.load %arg2[%c4_37, %c0_38, %c0_39] : memref<7x64x192xbf16, #tpu.memory_space<vmem>>, vector<1x64x192xbf16>
    %32 = vector.shape_cast %31 : vector<1x64x192xbf16> to vector<64x192xbf16>
    %cst_40 = arith.constant dense<0.000000e+00> : vector<16x192xf32>
    %33 = tpu.matmul %30, %32, %cst_40 {dimension_numbers = #tpu.dot_dimension_numbers<[1], [0], [0], [1], [0, 0, 1, 1], [], []>} : vector<16x64xbf16>, vector<64x192xbf16>, vector<16x192xf32> -> vector<16x192xf32>
    %34 = arith.addf %28, %33 : vector<16x192xf32>
    %c0_41 = arith.constant 0 : index
    %c5 = arith.constant 5 : index
    %c0_42 = arith.constant 0 : index
    %35 = vector.load %arg11[%c0_41, %c5, %c0_42] : memref<1x22x64xbf16, #tpu.memory_space<vmem>>, vector<1x16x64xbf16>
    %36 = vector.shape_cast %35 : vector<1x16x64xbf16> to vector<16x64xbf16>
    %c5_43 = arith.constant 5 : index
    %c0_44 = arith.constant 0 : index
    %c0_45 = arith.constant 0 : index
    %37 = vector.load %arg2[%c5_43, %c0_44, %c0_45] : memref<7x64x192xbf16, #tpu.memory_space<vmem>>, vector<1x64x192xbf16>
    %38 = vector.shape_cast %37 : vector<1x64x192xbf16> to vector<64x192xbf16>
    %cst_46 = arith.constant dense<0.000000e+00> : vector<16x192xf32>
    %39 = tpu.matmul %36, %38, %cst_46 {dimension_numbers = #tpu.dot_dimension_numbers<[1], [0], [0], [1], [0, 0, 1, 1], [], []>} : vector<16x64xbf16>, vector<64x192xbf16>, vector<16x192xf32> -> vector<16x192xf32>
    %40 = arith.addf %34, %39 : vector<16x192xf32>
    %c0_47 = arith.constant 0 : index
    %c6 = arith.constant 6 : index
    %c0_48 = arith.constant 0 : index
    %41 = vector.load %arg11[%c0_47, %c6, %c0_48] : memref<1x22x64xbf16, #tpu.memory_space<vmem>>, vector<1x16x64xbf16>
    %42 = vector.shape_cast %41 : vector<1x16x64xbf16> to vector<16x64xbf16>
    %c6_49 = arith.constant 6 : index
    %c0_50 = arith.constant 0 : index
    %c0_51 = arith.constant 0 : index
    %43 = vector.load %arg2[%c6_49, %c0_50, %c0_51] : memref<7x64x192xbf16, #tpu.memory_space<vmem>>, vector<1x64x192xbf16>
    %44 = vector.shape_cast %43 : vector<1x64x192xbf16> to vector<64x192xbf16>
    %cst_52 = arith.constant dense<0.000000e+00> : vector<16x192xf32>
    %45 = tpu.matmul %42, %44, %cst_52 {dimension_numbers = #tpu.dot_dimension_numbers<[1], [0], [0], [1], [0, 0, 1, 1], [], []>} : vector<16x64xbf16>, vector<64x192xbf16>, vector<16x192xf32> -> vector<16x192xf32>
    %46 = arith.addf %40, %45 : vector<16x192xf32>
    %c0_53 = arith.constant 0 : index
    %c0_54 = arith.constant 0 : index
    %47 = vector.load %arg3[%c0_53, %c0_54] : memref<1x192xf32, #tpu.memory_space<vmem>>, vector<1x192xf32>
    %48 = vector.broadcast %47 : vector<1x192xf32> to vector<16x192xf32>
    %49 = arith.mulf %46, %48 : vector<16x192xf32>
    %c0_55 = arith.constant 0 : index
    %c0_56 = arith.constant 0 : index
    %50 = vector.load %arg4[%c0_55, %c0_56] : memref<1x192xf32, #tpu.memory_space<vmem>>, vector<1x192xf32>
    %51 = vector.broadcast %50 : vector<1x192xf32> to vector<16x192xf32>
    %52 = arith.addf %49, %51 : vector<16x192xf32>
    %cst_57 = arith.constant 0.000000e+00 : f32
    %53 = vector.broadcast %cst_57 : f32 to vector<16x192xf32>
    %54 = arith.maximumf %52, %53 : vector<16x192xf32>
    %55 = vector.extract_strided_slice %54 {offsets = [0, 0], sizes = [16, 64], strides = [1, 1]} : vector<16x192xf32> to vector<16x64xf32>
    %56 = vector.extract_strided_slice %54 {offsets = [0, 64], sizes = [16, 64], strides = [1, 1]} : vector<16x192xf32> to vector<16x64xf32>
    %57 = arith.addf %55, %56 : vector<16x64xf32>
    %58 = vector.extract_strided_slice %54 {offsets = [0, 128], sizes = [16, 64], strides = [1, 1]} : vector<16x192xf32> to vector<16x64xf32>
    %59 = arith.addf %57, %58 : vector<16x64xf32>
    %60 = vector.shape_cast %59 : vector<16x64xf32> to vector<1x16x64xf32>
    %cst_58 = arith.constant dense<0.000000e+00> : vector<1x64xf32>
    %61 = vector.multi_reduction <add>, %60, %cst_58 [1] : vector<1x16x64xf32> to vector<1x64xf32>
    %c0_59 = arith.constant 0 : index
    %c0_60 = arith.constant 0 : index
    %62 = vector.load %arg5[%c0_59, %c0_60] : memref<64x32xf32, #tpu.memory_space<vmem>>, vector<64x32xf32>
    %cst_61 = arith.constant dense<0.000000e+00> : vector<1x32xf32>
    %63 = tpu.matmul %61, %62, %cst_61 {dimension_numbers = #tpu.dot_dimension_numbers<[1], [0], [0], [1], [0, 0, 1, 1], [], []>} : vector<1x64xf32>, vector<64x32xf32>, vector<1x32xf32> -> vector<1x32xf32>
    %c0_62 = arith.constant 0 : index
    %c0_63 = arith.constant 0 : index
    %64 = vector.load %arg6[%c0_62, %c0_63] : memref<1x32xf32, #tpu.memory_space<vmem>>, vector<1x32xf32>
    %65 = arith.addf %63, %64 : vector<1x32xf32>
    %c0_64 = arith.constant 0 : index
    %c0_65 = arith.constant 0 : index
    %66 = vector.load %arg7[%c0_64, %c0_65] : memref<32x12xf32, #tpu.memory_space<vmem>>, vector<32x12xf32>
    %cst_66 = arith.constant dense<0.000000e+00> : vector<1x12xf32>
    %67 = tpu.matmul %65, %66, %cst_66 {dimension_numbers = #tpu.dot_dimension_numbers<[1], [0], [0], [1], [0, 0, 1, 1], [], []>} : vector<1x32xf32>, vector<32x12xf32>, vector<1x12xf32> -> vector<1x12xf32>
    %c0_67 = arith.constant 0 : index
    %c0_68 = arith.constant 0 : index
    %68 = vector.load %arg8[%c0_67, %c0_68] : memref<1x12xf32, #tpu.memory_space<vmem>>, vector<1x12xf32>
    %69 = arith.addf %67, %68 : vector<1x12xf32>
    %70 = vector.extract_strided_slice %69 {offsets = [0, 0], sizes = [1, 4], strides = [1, 1]} : vector<1x12xf32> to vector<1x4xf32>
    %71 = vector.extract_strided_slice %69 {offsets = [0, 4], sizes = [1, 4], strides = [1, 1]} : vector<1x12xf32> to vector<1x4xf32>
    %72 = vector.extract_strided_slice %69 {offsets = [0, 8], sizes = [1, 4], strides = [1, 1]} : vector<1x12xf32> to vector<1x4xf32>
    %73 = arith.maximumf %70, %71 : vector<1x4xf32>
    %74 = arith.maximumf %73, %72 : vector<1x4xf32>
    %75 = arith.subf %70, %74 : vector<1x4xf32>
    %76 = math.exp %75 : vector<1x4xf32>
    %77 = arith.subf %71, %74 : vector<1x4xf32>
    %78 = math.exp %77 : vector<1x4xf32>
    %79 = arith.subf %72, %74 : vector<1x4xf32>
    %80 = math.exp %79 : vector<1x4xf32>
    %81 = arith.addf %76, %78 : vector<1x4xf32>
    %82 = arith.addf %81, %80 : vector<1x4xf32>
    %83 = arith.divf %76, %82 : vector<1x4xf32>
    %84 = arith.divf %78, %82 : vector<1x4xf32>
    %85 = arith.divf %80, %82 : vector<1x4xf32>
    %86 = tpu.concatenate %83, %84, %85 in 1 : vector<1x4xf32>, vector<1x4xf32>, vector<1x4xf32> -> vector<1x12xf32>
    %c0_69 = arith.constant 0 : index
    %c0_70 = arith.constant 0 : index
    %87 = vector.load %arg9[%c0_69, %c0_70] : memref<12x192xf32, #tpu.memory_space<vmem>>, vector<12x192xf32>
    %cst_71 = arith.constant dense<0.000000e+00> : vector<1x192xf32>
    %88 = tpu.matmul %86, %87, %cst_71 {dimension_numbers = #tpu.dot_dimension_numbers<[1], [0], [0], [1], [0, 0, 1, 1], [], []>} : vector<1x12xf32>, vector<12x192xf32>, vector<1x192xf32> -> vector<1x192xf32>
    %89 = vector.shape_cast %54 : vector<16x192xf32> to vector<1x16x192xf32>
    %90 = vector.shape_cast %88 : vector<1x192xf32> to vector<1x1x192xf32>
    %91 = vector.broadcast %90 : vector<1x1x192xf32> to vector<1x16x192xf32>
    %92 = arith.mulf %89, %91 : vector<1x16x192xf32>
    %93 = vector.extract_strided_slice %92 {offsets = [0, 0, 0], sizes = [1, 16, 64], strides = [1, 1, 1]} : vector<1x16x192xf32> to vector<1x16x64xf32>
    %94 = vector.extract_strided_slice %92 {offsets = [0, 0, 64], sizes = [1, 16, 64], strides = [1, 1, 1]} : vector<1x16x192xf32> to vector<1x16x64xf32>
    %95 = arith.addf %93, %94 : vector<1x16x64xf32>
    %96 = vector.extract_strided_slice %92 {offsets = [0, 0, 128], sizes = [1, 16, 64], strides = [1, 1, 1]} : vector<1x16x192xf32> to vector<1x16x64xf32>
    %97 = arith.addf %95, %96 : vector<1x16x64xf32>
    %c0_72 = arith.constant 0 : index
    %c0_73 = arith.constant 0 : index
    %c0_74 = arith.constant 0 : index
    %98 = vector.load %arg10[%c0_72, %c0_73, %c0_74] : memref<1x16x64xf32, #tpu.memory_space<vmem>>, vector<1x16x64xf32>
    tpu.vector_store %arg10[%c0_72, %c0_73, %c0_74], %97 {strides = array<i32>} : memref<1x16x64xf32, #tpu.memory_space<vmem>>, vector<1x16x64xf32>,
    return
  }
  func.func @transform_0(%arg0: i32) -> (i32, i32, i32) {
    %c0_i32 = arith.constant 0 : i32
    %c0_i32_0 = arith.constant 0 : i32
    %c0_i32_1 = arith.constant 0 : i32
    return %arg0, %c0_i32, %c0_i32_0 : i32, i32, i32
  }
  func.func @transform_1(%arg0: i32) -> (i32, i32, i32) {
    %c0_i32 = arith.constant 0 : i32
    %c0_i32_0 = arith.constant 0 : i32
    %c0_i32_1 = arith.constant 0 : i32
    %c0_i32_2 = arith.constant 0 : i32
    return %c0_i32, %c0_i32_0, %c0_i32_1 : i32, i32, i32
  }
  func.func @transform_2(%arg0: i32) -> (i32, i32) {
    %c0_i32 = arith.constant 0 : i32
    %c0_i32_0 = arith.constant 0 : i32
    %c0_i32_1 = arith.constant 0 : i32
    return %c0_i32, %c0_i32_0 : i32, i32
  }
  func.func @transform_3(%arg0: i32) -> (i32, i32) {
    %c0_i32 = arith.constant 0 : i32
    %c0_i32_0 = arith.constant 0 : i32
    %c0_i32_1 = arith.constant 0 : i32
    return %c0_i32, %c0_i32_0 : i32, i32
  }
  func.func @transform_4(%arg0: i32) -> (i32, i32) {
    %c0_i32 = arith.constant 0 : i32
    %c0_i32_0 = arith.constant 0 : i32
    %c0_i32_1 = arith.constant 0 : i32
    return %c0_i32, %c0_i32_0 : i32, i32
  }
  func.func @transform_5(%arg0: i32) -> (i32, i32) {
    %c0_i32 = arith.constant 0 : i32
    %c0_i32_0 = arith.constant 0 : i32
    %c0_i32_1 = arith.constant 0 : i32
    return %c0_i32, %c0_i32_0 : i32, i32
  }
  func.func @transform_6(%arg0: i32) -> (i32, i32) {
    %c0_i32 = arith.constant 0 : i32
    %c0_i32_0 = arith.constant 0 : i32
    %c0_i32_1 = arith.constant 0 : i32
    return %c0_i32, %c0_i32_0 : i32, i32
  }
  func.func @transform_7(%arg0: i32) -> (i32, i32) {
    %c0_i32 = arith.constant 0 : i32
    %c0_i32_0 = arith.constant 0 : i32
    %c0_i32_1 = arith.constant 0 : i32
    return %c0_i32, %c0_i32_0 : i32, i32
  }
  func.func @transform_8(%arg0: i32) -> (i32, i32) {
    %c0_i32 = arith.constant 0 : i32
    %c0_i32_0 = arith.constant 0 : i32
    %c0_i32_1 = arith.constant 0 : i32
    return %c0_i32, %c0_i32_0 : i32, i32
  }
  func.func @transform_9(%arg0: i32) -> (i32, i32, i32) {
    %c0_i32 = arith.constant 0 : i32
    %c0_i32_0 = arith.constant 0 : i32
    %c0_i32_1 = arith.constant 0 : i32
    return %arg0, %c0_i32, %c0_i32_0 : i32, i32, i32
  }
}

</mosaic_0001>

<bundles_post_ra>
// kernel: tpu_custom_call.1
= control target key start
LH: loop header
LB: loop body
LE: loop exit
PB: predicated region body
PF: predicated region fallthrough
CT: control target
= control target key end

     0   :  { %14 = vsyncpa [#allocation4], 0  ;;  %s2281_s0 = inlined_call_operand.vmem [shape: f32[2,16,64], index: 0, kind: input, shape index: {}]   ;;  %s2282_s1 = inlined_call_operand.hbm [shape: bf16[7,64,192], index: 1, kind: input, shape index: {}]   ;;  %s2283_s2 = inlined_call_operand.vmem [shape: f32[1,192], index: 2, kind: input, shape index: {}]   ;;  %s2284_s3 = inlined_call_operand.vmem [shape: f32[1,192], index: 3, kind: input, shape index: {}]   ;;  %s2285_s4 = inlined_call_operand.vmem [shape: f32[64,32], index: 4, kind: input, shape index: {}]   ;;  %s2286_s5 = inlined_call_operand.vmem [shape: f32[1,32], index: 5, kind: input, shape index: {}]   ;;  %s2287_s6 = inlined_call_operand.vmem [shape: f32[32,12], index: 6, kind: input, shape index: {}]   ;;  %s2288_s7 = inlined_call_operand.vmem [shape: f32[1,12], index: 7, kind: input, shape index: {}]   ;;  %s2289_s8 = inlined_call_operand.vmem [shape: f32[12,192], index: 8, kind: input, shape index: {}]   ;;  %s2290_s9 = inlined_call_operand.hbm [shape: f32[2,16,64], index: 9, kind: output, shape index: {}]  }
   0x1   :  { %15 = vsyncpa [#allocation5], 0 }
   0x2   :  { %17 = vsyncpa [#allocation5 + $0x1], 0  ;;  %s1979_s30 = smov 0   ;;  %s1981_s10 = smov 0  }
   0x3   :  { %s1983_s11 = smov 0   ;;  %s1985_s12 = smov 0  }
   0x4 LB: > { %s2000_s13 = sadd.s32 4294967295, %s1918_s12   ;;  %s1432_s14 = sadd.s32 4294967294, %s1918_s12   ;;  %s1918_s12 = sphi %s1985_s12, %s2304_s12   ;;  %s1914_s11 = sphi %s1983_s11, %s2303_s11   ;;  %s1910_s10 = sphi %s1981_s10, %s2302_s10   ;;  %s1906_s30 = sphi %s1979_s30, %s2301_s30  }
   0x5   : > { %s2004_s15 = sadd.s32 1, %s1918_s12   ;;  %s224_s16 = sadd.s32 1, %s1914_s11 }
   0x6   : > { %s221_s17 = ssub.s32 %s1918_s12, %s2004_s15  ;;  %p234_p0 = scmp.ne.s32.totalorder %s1914_s11, %s1910_s10 }
   0x7   : > { %p222_p1 = scmp.eq.s32.totalorder %s221_s17, 0  ;;  %p235_p2 = scmp.eq.s32.totalorder %s2000_s13, 1 }
   0x8   : > { %p240_p3 = scmp.ne.s32.totalorder %s1910_s10, %s1906_s30  ;;  %p241_p4 = scmp.eq.s32.totalorder %s1432_s14, 1 }
   0x9   : > { %s2015_s18 = scalar_select %p222_p1, %s1914_s11, %s224_s16  }
   0xa   : > { %p2017_p5 = por %p235_p2, %p234_p0  ;;  %p2021_p6 = por %p241_p4, %p240_p3 }
   0xb   : > { %p1433_p7 = scmp.ge.s32.totalorder %s1918_s12, 1  ;;  %p248_p8 = scmp.lt.s32.totalorder %s1918_s12, 3 }
   0xc   : > { %p1766_p9 = scmp.eq.s32.totalorder %s2000_s13, 0  ;;  %s259_s23 = sshll.u32 %s2282_s1, 4  ;;  %s260_s23 = int_to_ptr.hbm [resolvable:$true] %s259_s23 }
   0xd   : > { %p249_p10 = pnand %p1433_p7, %p248_p8  ;;  %s1920_s24 = smov [#allocation3]  }
   0xe   : > { %s261_s25 = sshll.u32 %s1920_s24, 4  ;;  %s1921_s26 = smov 128   ;;  %s262_s25 = int_to_ptr.vmem [resolvable:$true] %s261_s25 }
   0xf   : > { %p1758_p11 = pneg %p249_p10  ;;  %s1922_s27 = smov 8  }
  0x10   : > { %306 = sbr.rel (%p249_p10) target bundleno = 1397 (0x575), region = 56 }
  0x11   : > { %p1759_p12 = pnand %p1766_p9, %p1758_p11 }
  0x13   : > { %1761 = dma.hbm_to_vmem [thread:$0]  (!%p1759_p12), %s260_s23, 7168, %s262_s25, [#allocation4], %s1921_s26, %s1921_s26, %s1922_s27  }
  0x15   : > { %1897 = dma.done.wait (%p1766_p9), [#allocation4], 7168  }
  0x16   : > { %1899 = vsyncadd (%p1766_p9), [#allocation4], 4294960128  ;;  %p343_p13 = scmp.lt.s32.totalorder %s2000_s13, 1  ;;  %vm349_vm0 = vcmask 517120   ;;  %vm350_vm1 = vsmask.f32 1280 }
  0x17   : > { %vm2040_vm2 = vmand %vm349_vm0, %vm350_vm1  ;;  %vm355_vm3 = vcmask 518145   ;;  %vm356_vm4 = vsmask.f32 7942  ;;  %v1501_v1 = vld [vmem:[#allocation3 + $0x30] sm:$0xf]  ;;  %vm389_vm7 = vcmask 519169  }
  0x18   : > { %s344_s28 = scalar_select %p343_p13, %s2000_s13, 1  ;;  %v1698_v2 = vld [vmem:[#allocation3 + $0x34] sm:$0xf0]  ;;  %v1493_v3 = vld [vmem:[#allocation3 + $0x20] sm:$0xf]  ;;  %vm2048_vm5 = vmand %vm355_vm3, %vm356_vm4  ;;  %vm394_vm9 = vcmask 519168  }
  0x19   : > { %v1502_v4 = vor.u32 %v1698_v2, %v1501_v1  ;;  %v1696_v5 = vld [vmem:[#allocation3 + $0x24] sm:$0xf0]  ;;  %v1467_v6 = vld [vmem:[#allocation3 + $0x70] sm:$0xf]  ;;  %v1706_v7 = vld [vmem:[#allocation3 + $0x74] sm:$0xf0] }
  0x1a   : > { %s1690_s29 = sshll.u32 %s344_s28, 4  ;;  %v1468_v8 = vor.u32 %v1706_v7, %v1467_v6  ;;  %v1459_v9 = vld [vmem:[#allocation3 + $0x60] sm:$0xf]  ;;  %vm365_vm6 = vsmask.f32 5392  ;;  %v1494_v11 = vor.u32 %v1696_v5, %v1493_v3  ;;  %vm2058_vm8 = vmand %vm389_vm7, %vm356_vm4  ;;  %vm480_vm11 = vcmask 523264  }
  0x1b   : > { %s347_s17 = scalar_lea.vmem %s2281_s0, %s1690_s29  ;;  %558 = vmatpush.bf16.msra.mxu2 %v1502_v4  ;;  %v1485_v12 = vld [vmem:[#allocation3 + $0x10] sm:$0xf]  ;;  %v1694_v13 = vld [vmem:[#allocation3 + $0x14] sm:$0xf0]  ;;  %v1704_v14 = vld [vmem:[#allocation3 + $0x64] sm:$0xf0] }
  0x1c   : > { %488 = vmatpush.bf16.msra.mxu0 %v1468_v8  ;;  %v1460_v15 = vor.u32 %v1704_v14, %v1459_v9  ;;  %v1451_v16 = vld [vmem:[#allocation3 + $0x50] sm:$0xf]  ;;  %v1702_v17 = vld [vmem:[#allocation3 + $0x54] sm:$0xf0]  ;;  %v352_v18 = vld [vmem:[#allocation2] sm:$0x3]  ;;  %v1486_v27 = vor.u32 %v1694_v13, %v1485_v12 }
  0x1d   : > { %v353_v19 = vsel %vm2040_vm2, 0, %v352_v18  ;;  %v358_v20 = vld [vmem:[#allocation2 + $0x8] sm:$0x6]  ;;  %v361_v21 = vld [vmem:[%s347_s17] sm:$0xff]  ;;  %v1477_v23 = vld [vmem:[#allocation3] sm:$0xf]  ;;  %v1452_v29 = vor.u32 %v1702_v17, %v1451_v16 }
  0x1e   : > { %v362_v22 = vld [vmem:[%s347_s17 + $0x8] sm:$0xff]  ;;  %354 = vst [vmem:[#allocation2] sm:$0x3] %v353_v19  ;;  %v359_v24 = vsel %vm2048_vm5, 0, %v358_v20  ;;  %v363_v25 = vpack.c.bf16 %v361_v21, %v361_v21  ;;  %v1692_v28 = vld [vmem:[#allocation3 + $0x4] sm:$0xf0]  ;;  %vm2064_vm10 = vmor %vm350_vm1, %vm365_vm6 }
  0x1f   : > { %v364_v26 = vpack.c.bf16 %v362_v22, %v362_v22  ;;  %559 = vmatpush.bf16.msra.mxu2 %v1494_v11  ;;  %360 = vst [vmem:[#allocation2 + $0x8] sm:$0x6] %v359_v24  ;;  %v1443_v30 = vld [vmem:[#allocation3 + $0x40] sm:$0xf]  ;;  %v1700_v35 = vld [vmem:[#allocation3 + $0x44] sm:$0xf0]  ;;  %v1478_v44 = vor.u32 %v1692_v28, %v1477_v23 }
  0x20   : > { %489 = vmatpush.bf16.msra.mxu0 %v1460_v15  ;;  %v368_v31 = vshrl.u32 %v363_v25, 16  ;;  %v371_v32 = vshll.u32 %v363_v25, 16  ;;  %v1569_v36 = vld [vmem:[#allocation3 + $0xf0] sm:$0xf]  ;;  %v1722_v37 = vld [vmem:[#allocation3 + $0xf4] sm:$0xf0]  ;;  %v1444_v49 = vor.u32 %v1700_v35, %v1443_v30 }
  0x21   : > { %v377_v33 = vshrl.u32 %v364_v26, 16  ;;  %v380_v34 = vshll.u32 %v364_v26, 16  ;;  %v1535_v38 = vld [vmem:[#allocation3 + $0xb0] sm:$0xf]  ;;  %v1714_v43 = vld [vmem:[#allocation3 + $0xb4] sm:$0xf0]  ;;  %v1570_v50 = vor.u32 %v1722_v37, %v1569_v36 }
  0x22   : > { %v370_v39 = vrot.slane %v368_v31, 6  ;;  %v373_v40 = vrot.slane %v371_v32, 7  ;;  %v1561_v51 = vld [vmem:[#allocation3 + $0xe0] sm:$0xf]  ;;  %v1536_v53 = vor.u32 %v1714_v43, %v1535_v38  ;;  %v1720_v54 = vld [vmem:[#allocation3 + $0xe4] sm:$0xf0] }
  0x23   : > { %v379_v41 = vrot.slane %v377_v33, 6  ;;  %v382_v42 = vrot.slane %v380_v34, 7  ;;  %560 = vmatpush.bf16.msra.mxu2 %v1486_v27  ;;  %v1527_v55 = vld [vmem:[#allocation3 + $0xa0] sm:$0xf]  ;;  %v1712_v60 = vld [vmem:[#allocation3 + $0xa4] sm:$0xf0]  ;;  %v1562_v63 = vor.u32 %v1720_v54, %v1561_v51 }
  0x24   : > { %490 = vmatpush.bf16.msra.mxu0 %v1452_v29  ;;  %v374_v47 = vor.u32 %v373_v40, %v370_v39  ;;  %v1528_v1 = vor.u32 %v1712_v60, %v1527_v55  ;;  %v1553_v2 = vld [vmem:[#allocation3 + $0xd0] sm:$0xf]  ;;  %v1718_v3 = vld [vmem:[#allocation3 + $0xd4] sm:$0xf0]  ;;  %v1545_v7 = vld [vmem:[#allocation3 + $0xc0] sm:$0xf] }
  0x25   : > { %v383_v48 = vor.u32 %v382_v42, %v379_v41  ;;  %v391_v52 = vld [vmem:[#allocation2] sm:$0xe]  ;;  %v1519_v4 = vld [vmem:[#allocation3 + $0x90] sm:$0xf]  ;;  %v1710_v5 = vld [vmem:[#allocation3 + $0x94] sm:$0xf0]  ;;  %v1554_v6 = vor.u32 %v1718_v3, %v1553_v2 }
  0x26   : > { %v375_v56 = vrot.slane %v374_v47, 4  ;;  %v392_v58 = vsel %vm2058_vm8, %v374_v47, %v391_v52  ;;  %v396_v59 = vld [vmem:[#allocation2 + $0x8] sm:$0x3]  ;;  %v1520_v8 = vor.u32 %v1710_v5, %v1519_v4  ;;  %v1716_v0 = vld [vmem:[#allocation3 + $0xc4] sm:$0xf0]  ;;  %vm595_vm14 = vcmask 1046528  }
  0x27   : > { %v385_v57 = vrot.slane %v383_v48, 4  ;;  %561 = vmatpush.bf16.msra.mxu2 %v1478_v44  ;;  %393 = vst [vmem:[#allocation2] sm:$0xe] %v392_v58  ;;  %v1511_v9 = vld [vmem:[#allocation3 + $0x80] sm:$0xf]  ;;  %v1546_v16 = vor.u32 %v1716_v0, %v1545_v7  ;;  %vm793_vm0 = vcmask 1045504  }
  0x28   : > { %v384_v61 = vsel %vm2064_vm10, %v375_v56, %v383_v48  ;;  %491 = vmatpush.bf16.msra.mxu0 %v1444_v49  ;;  %v1708_v10 = vld [vmem:[#allocation3 + $0x84] sm:$0xf0]  ;;  %v1637_v12 = vld [vmem:[#allocation3 + $0x170] sm:$0xf]  ;;  %v1738_v13 = vld [vmem:[#allocation3 + $0x174] sm:$0xf0] }
  0x29   : > { %v397_v62 = vsel %vm2040_vm2, %v385_v57, %v396_v59  ;;  %395 = vst.msk [vmem:[#allocation2 + $0x4] sm:$0xf] %vm394_vm9, %v384_v61  ;;  %v1512_v20 = vor.u32 %v1708_v10, %v1511_v9  ;;  %v1638_v22 = vor.u32 %v1738_v13, %v1637_v12  ;;  %v1629_v26 = vld [vmem:[#allocation3 + $0x160] sm:$0xf]  ;;  %v1736_v27 = vld [vmem:[#allocation3 + $0x164] sm:$0xf0] }
  0x2a   : > { %398 = vst [vmem:[#allocation2 + $0x8] sm:$0x3] %v397_v62  ;;  %v1603_v32 = vld [vmem:[#allocation3 + $0x130] sm:$0xf]  ;;  %v1730_v33 = vld [vmem:[#allocation3 + $0x134] sm:$0xf0]  ;;  %v1630_v36 = vor.u32 %v1736_v27, %v1629_v26 }
  0x2b   : > { %752 = vmatpush.bf16.msrb.mxu2 %v1570_v50  ;;  %v1621_v37 = vld [vmem:[#allocation3 + $0x150] sm:$0xf]  ;;  %v1734_v38 = vld [vmem:[#allocation3 + $0x154] sm:$0xf0]  ;;  %vm427_vm12 = vsmask.f32 7424  ;;  %v1604_v50 = vor.u32 %v1730_v33, %v1603_v32 }
  0x2c   : > { %646 = vmatpush.bf16.msrb.mxu0 %v1536_v53  ;;  %v1595_v52 = vld [vmem:[#allocation3 + $0x120] sm:$0xf]  ;;  %v1728_v53 = vld [vmem:[#allocation3 + $0x124] sm:$0xf0]  ;;  %v1622_v54 = vor.u32 %v1734_v38, %v1621_v37  ;;  %vm687_vm13 = vsmask.f32 6400 }
  0x2d   : > { %v1613_v59 = vld [vmem:[#allocation3 + $0x140] sm:$0xf]  ;;  %v1732_v60 = vld [vmem:[#allocation3 + $0x144] sm:$0xf0]  ;;  %v1596_v61 = vor.u32 %v1728_v53, %v1595_v52  ;;  %v1587_v62 = vld [vmem:[#allocation3 + $0x110] sm:$0xf] }
  0x2e   : > { %v582_v11 = vld [vmem:[#allocation2] sm:$0xe]  ;;  %v1614_v3 = vor.u32 %v1732_v60, %v1613_v59  ;;  %v1724_v7 = vld [vmem:[#allocation3 + $0x104] sm:$0xf0]  ;;  %vm885_vm15 = vsmask.f32 5376 }
  0x2f   : > { %753 = vmatpush.bf16.msrb.mxu2 %v1562_v63  ;;  %v593_v14 = vunpack.c.l.b16 %v582_v11  ;;  %v780_v39 = vld [vmem:[#allocation2] sm:$0xc]  ;;  %v1726_v63 = vld [vmem:[#allocation3 + $0x114] sm:$0xf0]  ;;  %v1655_v33 = vld [vmem:[#allocation3 + $0x190] sm:$0xf] }
  0x30   : > { %647 = vmatpush.bf16.msrb.mxu0 %v1528_v1  ;;  %v2075_v15 = vld [vmem:[#allocation2] sm:$0xff]   ;;  %v791_v51 = vunpack.c.l.b16 %v780_v39  ;;  %v1588_v5 = vor.u32 %v1726_v63, %v1587_v62  ;;  %v1503_v38 = vld [vmem:[#allocation3 + $0x38] sm:$0xf0]  ;;  %v1699_v53 = vld [vmem:[#allocation3 + $0x44] sm:$0xf]  ;;  %vm991_vm1 = vcmask 1044480  }
  0x31   : > { %v2078_v17 = vunpack.c.h.b16 %v2075_v15  ;;  %1507 = vmatmul.msk.bf16.vlgmr.msra.gmra.mxu2 %vm480_vm11, %v2075_v15  ;;  %v409_v18 = vld [vmem:[#allocation2 + $0x8] sm:$0x1]  ;;  %v431_v19 = vshll.u32 %v2075_v15, 16  ;;  %v429_v24 = vshrl.u32 %v2075_v15, 16  ;;  %v1697_v37 = vld [vmem:[#allocation3 + $0x34] sm:$0xf] }
  0x32   : > { %v674_v21 = vld [vmem:[#allocation2 + $0x8] sm:$0x3]  ;;  %v424_v23 = vunpack.c.l.b16 %v409_v18  ;;  %v1713_v60 = vld [vmem:[#allocation3 + $0xb4] sm:$0xf]  ;;  %v1691_v62 = vld [vmem:[#allocation3 + $0x4] sm:$0xf] }
  0x33   : > { %754 = vmatpush.bf16.msrb.mxu2 %v1554_v6  ;;  %v685_v25 = vunpack.c.l.b16 %v674_v21  ;;  %v433_v28 = vrot.slane %v431_v19, 1  ;;  %v2085_v29 = vpack.c.b16 %v2078_v17, %v593_v14  ;;  %v872_v46 = vld [vmem:[#allocation2 + $0x8] sm:$0x7]  ;;  %v2101_v1 = vpack.c.b16 %v2078_v17, %v791_v51  ;;  %v1579_v6 = vld [vmem:[#allocation3 + $0x100] sm:$0xf]  ;;  %s1923_s25 = smov 64  }
  0x34   : > { %648 = vmatpush.bf16.msrb.mxu0 %v1520_v8  ;;  %v2087_v30 = vpack.c.b16 %v424_v23, %v424_v23  ;;  %v883_v58 = vunpack.c.l.b16 %v872_v46  ;;  %v1580_v13 = vor.u32 %v1724_v7, %v1579_v6  ;;  %v1671_v14 = vld [vmem:[#allocation3 + $0x1b0] sm:$0xf]  ;;  %v1487_v51 = vld [vmem:[#allocation3 + $0x18] sm:$0xf0]  ;;  %v1479_v63 = vld [vmem:[#allocation3 + $0x8] sm:$0xf0] }
  0x35   : > { %v2089_v31 = vpack.c.b16 %v685_v25, %v685_v25  ;;  %v689_v34 = vshrl.u32 %v2085_v29, 16  ;;  %v692_v35 = vshll.u32 %v2085_v29, 16  ;;  %v434_v40 = vor.u32 %v433_v28, %v429_v24  ;;  %v1663_v24 = vld [vmem:[#allocation3 + $0x1a0] sm:$0xf]  ;;  %v1744_v25 = vld [vmem:[#allocation3 + $0x1a4] sm:$0xf0] }
  0x36   : > { %v436_v41 = vshll.u32 %v2087_v30, 16  ;;  %v2105_v4 = vpack.c.b16 %v883_v58, %v883_v58  ;;  %v887_v8 = vshrl.u32 %v2101_v1, 16  ;;  %v890_v0 = vshll.u32 %v2101_v1, 16  ;;  %v1705_v28 = vld [vmem:[#allocation3 + $0x74] sm:$0xf]  ;;  %s1924_s17 = smov 124  }
  0x37   : > { %755 = vmatpush.bf16.msrb.mxu2 %v1546_v16  ;;  %v697_v42 = vshrl.u32 %v2089_v31, 16  ;;  %v700_v43 = vshll.u32 %v2089_v31, 16  ;;  %v691_v44 = vrot.slane %v689_v34, 1  ;;  %v694_v45 = vrot.slane %v692_v35, 2  ;;  %v1746_v16 = vld [vmem:[#allocation3 + $0x1b4] sm:$0xf0] }
  0x38   : > { %649 = vmatpush.bf16.msrb.mxu0 %v1512_v20  ;;  %v438_v47 = vrot.slane %v436_v41, 1  ;;  %v895_v9 = vshrl.u32 %v2105_v4, 16  ;;  %v898_v10 = vshll.u32 %v2105_v4, 16  ;;  %v596_v11 = vrot.slane %v2085_v29, 1  ;;  %v1469_v29 = vld [vmem:[#allocation3 + $0x78] sm:$0xf0] }
  0x39   : > { %v699_v48 = vrot.slane %v697_v42, 1  ;;  %v702_v49 = vrot.slane %v700_v43, 2  ;;  %v695_v56 = vor.u32 %v694_v45, %v691_v44  ;;  %v597_v12 = vrot.slane %v2087_v30, 1  ;;  %v1703_v30 = vld [vmem:[#allocation3 + $0x64] sm:$0xf]  ;;  %s1925_s21 = smov 120  }
  0x3a   : > { %v2096_v55 = vsel %vm427_vm12, %v434_v40, %v438_v47  ;;  %v889_v18 = vrot.slane %v887_v8, 2  ;;  %v892_v19 = vrot.slane %v890_v0, 3  ;;  %v897_v20 = vrot.slane %v895_v9, 2  ;;  %v1461_v35 = vld [vmem:[#allocation3 + $0x68] sm:$0xf0]  ;;  %s1926_s22 = smov 4  }
  0x3b   : > { %950 = vmatpush.bf16.msra.mxu2 %v1638_v22  ;;  %v703_v57 = vor.u32 %v702_v49, %v699_v48  ;;  %1473 = vmatmul.msk.bf16.vlgmr.msra.gmra.mxu0 %vm480_vm11, %v2096_v55  ;;  %v900_v21 = vrot.slane %v898_v10, 3  ;;  %v2115_v22 = vsel %vm595_vm14, %v596_v11, %v597_v12  ;;  %v1672_v23 = vor.u32 %v1746_v16, %v1671_v14  ;;  %v1695_v42 = vld [vmem:[#allocation3 + $0x24] sm:$0xf]  ;;  %v1495_v43 = vld [vmem:[#allocation3 + $0x28] sm:$0xf0]  ;;  %s1927_s23 = smov 8  }
  0x3c   : > { %844 = vmatpush.bf16.msra.mxu0 %v1604_v50  ;;  %v893_v26 = vor.u32 %v892_v19, %v889_v18  ;;  %v1664_v32 = vor.u32 %v1744_v25, %v1663_v24  ;;  %v1472_v34 = vor.u32 %v1705_v28, %v1469_v29  ;;  %v1464_v40 = vor.u32 %v1703_v30, %v1461_v35  ;;  %v1701_v44 = vld [vmem:[#allocation3 + $0x54] sm:$0xf]  ;;  %v1453_v45 = vld [vmem:[#allocation3 + $0x58] sm:$0xf0]  ;;  %v1647_v47 = vld [vmem:[#allocation3 + $0x180] sm:$0xf] }
  0x3d   : > { %v2103_v2 = vsel %vm687_vm13, %v695_v56, %v703_v57  ;;  %v901_v27 = vor.u32 %v900_v21, %v897_v20  ;;  %v1506_v41 = vor.u32 %v1697_v37, %v1503_v38  ;;  %v1498_v48 = vor.u32 %v1695_v42, %v1495_v43  ;;  %v1740_v49 = vld [vmem:[#allocation3 + $0x184] sm:$0xf0]  ;;  %v1693_v50 = vld [vmem:[#allocation3 + $0x14] sm:$0xf]  ;;  %v1571_v6 = vld [vmem:[#allocation3 + $0xf8] sm:$0xf0] }
  0x3e   : > { %502 = vmatpush.bf16.msra.mxu1 %v1472_v34  ;;  %v1456_v52 = vor.u32 %v1701_v44, %v1453_v45  ;;  %v794_v56 = vrot.slane %v2101_v1, 2  ;;  %v795_v57 = vrot.slane %v2089_v31, 2  ;;  %v1648_v58 = vor.u32 %v1740_v49, %v1647_v47  ;;  %v1711_v31 = vld [vmem:[#allocation3 + $0xa4] sm:$0xf]  ;;  %v1529_v0 = vld [vmem:[#allocation3 + $0xa8] sm:$0xf0] }
  0x3f   : > { %951 = vmatpush.bf16.msra.mxu2 %v1630_v36  ;;  %v1742_v36 = vld [vmem:[#allocation3 + $0x194] sm:$0xf0]  ;;  %v2119_v39 = vsel %vm885_vm15, %v893_v26, %v901_v27  ;;  %572 = vmatpush.bf16.msra.mxu3 %v1506_v41  ;;  %v1490_v59 = vor.u32 %v1693_v50, %v1487_v51  ;;  %v1482_v1 = vor.u32 %v1691_v62, %v1479_v63  ;;  %v978_v9 = vld [vmem:[#allocation2] sm:$0x8]  ;;  %v1719_v11 = vld [vmem:[#allocation3 + $0xe4] sm:$0xf] }
  0x40   : > { %845 = vmatpush.bf16.msra.mxu0 %v1596_v61  ;;  %v1656_v46 = vor.u32 %v1742_v36, %v1655_v33  ;;  %v1537_v61 = vld [vmem:[#allocation3 + $0xb8] sm:$0xf0]  ;;  %v2125_v8 = vsel %vm793_vm0, %v794_v56, %v795_v57  ;;  %v1563_v12 = vld [vmem:[#allocation3 + $0xe8] sm:$0xf0]  ;;  %v989_v14 = vunpack.c.l.b16 %v978_v9  ;;  %v1709_v16 = vld [vmem:[#allocation3 + $0x94] sm:$0xf] }
  0x41   : > { %1575 = vmatmul.msk.bf16.vlgmr.msrb.gmra.mxu2 %vm480_vm11, %v2103_v2  ;;  %v1540_v7 = vor.u32 %v1713_v60, %v1537_v61  ;;  %v1521_v18 = vld [vmem:[#allocation3 + $0x98] sm:$0xf0]  ;;  %v1566_v19 = vor.u32 %v1719_v11, %v1563_v12  ;;  %v1717_v20 = vld [vmem:[#allocation3 + $0xd4] sm:$0xf]  ;;  %v1707_v25 = vld [vmem:[#allocation3 + $0x84] sm:$0xf] }
  0x42   : > { %503 = vmatpush.bf16.msra.mxu1 %v1464_v40  ;;  %v1555_v21 = vld [vmem:[#allocation3 + $0xd8] sm:$0xf0]  ;;  %v990_v24 = vpack.c.b16 %v2078_v17, %v989_v14  ;;  %v1513_v26 = vld [vmem:[#allocation3 + $0x88] sm:$0xf0]  ;;  %v1729_v28 = vld [vmem:[#allocation3 + $0x134] sm:$0xf] }
  0x43   : > { %952 = vmatpush.bf16.msra.mxu2 %v1622_v54  ;;  %v1445_v54 = vld [vmem:[#allocation3 + $0x48] sm:$0xf0]  ;;  %573 = vmatpush.bf16.msra.mxu3 %v1498_v48  ;;  %v1558_v27 = vor.u32 %v1717_v20, %v1555_v21  ;;  %v1605_v29 = vld [vmem:[#allocation3 + $0x138] sm:$0xf0]  ;;  %v1715_v30 = vld [vmem:[#allocation3 + $0xc4] sm:$0xf] }
  0x44   : > { %846 = vmatpush.bf16.msra.mxu0 %v1588_v5  ;;  %v1721_v5 = vld [vmem:[#allocation3 + $0xf4] sm:$0xf]  ;;  %v1639_v34 = vld [vmem:[#allocation3 + $0x178] sm:$0xf0]  ;;  %v992_v35 = vrot.slane %v990_v24, 3  ;;  %v993_v36 = vrot.slane %v2105_v4, 3  ;;  %v1608_v37 = vor.u32 %v1729_v28, %v1605_v29 }
  0x45   : > { %v1574_v10 = vor.u32 %v1721_v5, %v1571_v6  ;;  %v1737_v33 = vld [vmem:[#allocation3 + $0x174] sm:$0xf]  ;;  %v1727_v17 = vld [vmem:[#allocation3 + $0x124] sm:$0xf]  ;;  %v1597_v38 = vld [vmem:[#allocation3 + $0x128] sm:$0xf0] }
  0x46   : > { %504 = vmatpush.bf16.msra.mxu1 %v1456_v52  ;;  %v1642_v40 = vor.u32 %v1737_v33, %v1639_v34  ;;  %v1735_v41 = vld [vmem:[#allocation3 + $0x164] sm:$0xf]  ;;  %v1631_v42 = vld [vmem:[#allocation3 + $0x168] sm:$0xf0]  ;;  %v994_v43 = vsel %vm991_vm1, %v992_v35, %v993_v36  ;;  %v1600_v44 = vor.u32 %v1727_v17, %v1597_v38  ;;  %v1725_v45 = vld [vmem:[#allocation3 + $0x114] sm:$0xf] }
  0x47   : > { %953 = vmatpush.bf16.msra.mxu2 %v1614_v3  ;;  %v1448_v3 = vor.u32 %v1699_v53, %v1445_v54  ;;  %574 = vmatpush.bf16.msra.mxu3 %v1490_v59  ;;  %v1634_v47 = vor.u32 %v1735_v41, %v1631_v42  ;;  %v1733_v4 = vld [vmem:[#allocation3 + $0x154] sm:$0xf]  ;;  %v1623_v48 = vld [vmem:[#allocation3 + $0x158] sm:$0xf0]  ;;  %v1723_v50 = vld [vmem:[#allocation3 + $0x104] sm:$0xf] }
  0x48   : > { %847 = vmatpush.bf16.msra.mxu0 %v1580_v13  ;;  %v1532_v13 = vor.u32 %v1711_v31, %v1529_v0  ;;  %v1581_v51 = vld [vmem:[#allocation3 + $0x108] sm:$0xf0]  ;;  %v1626_v52 = vor.u32 %v1733_v4, %v1623_v48  ;;  %v1745_v53 = vld [vmem:[#allocation3 + $0x1b4] sm:$0xf]  ;;  %v1673_v54 = vld [vmem:[#allocation3 + $0x1b8] sm:$0xf0] }
  0x49   : > { %v1731_v56 = vld [vmem:[#allocation3 + $0x144] sm:$0xf]  ;;  %v1615_v57 = vld [vmem:[#allocation3 + $0x148] sm:$0xf0]  ;;  %v1676_v59 = vor.u32 %v1745_v53, %v1673_v54  ;;  %v1741_v63 = vld [vmem:[#allocation3 + $0x194] sm:$0xf] }
  0x4a   : > { %505 = vmatpush.bf16.msra.mxu1 %v1448_v3  ;;  %v1618_v60 = vor.u32 %v1731_v56, %v1615_v57  ;;  %v1743_v61 = vld [vmem:[#allocation3 + $0x1a4] sm:$0xf]  ;;  %v1665_v62 = vld [vmem:[#allocation3 + $0x1a8] sm:$0xf0]  ;;  %v1657_v3 = vld [vmem:[#allocation3 + $0x198] sm:$0xf0] }
  0x4b   : > { %1541 = vmatmul.msk.bf16.vlgmr.msrb.gmra.mxu0 %vm480_vm11, %v2115_v22  ;;  %575 = vmatpush.bf16.msra.mxu3 %v1482_v1  ;;  %v1660_v5 = vor.u32 %v1741_v63, %v1657_v3  ;;  %v1739_v6 = vld [vmem:[#allocation3 + $0x184] sm:$0xf]  ;;  %v1080_v28 = vld [vmem:[%s2284_s3] sm:$0x3]  ;;  %vm1152_vm2 = vcmask 261120   ;;  %vm1275_vm7 = vcmask 1043456  }
  0x4c   : > { %1042 = vmatpush.bf16.msrb.mxu0 %v1672_v23  ;;  %v1524_v23 = vor.u32 %v1709_v16, %v1521_v18  ;;  %v1082_v34 = vperm.slane %v1080_v28, 0  ;;  %v1083_v3 = vperm.slane %v1080_v28, 1  ;;  %vm1263_vm1 = vcmask 31744   ;;  %s1747_s26 = sshll.u32 %s2000_s13, 4  ;;  %s1872_s27 = scalar_lea.hbm %s2290_s9, 32 }
  0x4d   : > { %1474 = vmatmul.msk.bf16.vlgmr.msra.gmra.mxu1 %vm480_vm11, %v2096_v55  ;;  %v1516_v55 = vor.u32 %v1707_v25, %v1513_v26  ;;  %v1070_v26 = vld [vmem:[%s2283_s2] sm:$0x3]  ;;  %s1354_s29 = scalar_lea.hbm %s2290_s9, %s1747_s26 }
  0x4e   : > { %660 = vmatpush.bf16.msrb.mxu1 %v1540_v7  ;;  %1508 = vmatmul.msk.bf16.vlgmr.msra.gmra.mxu3 %vm480_vm11, %v2075_v15  ;;  %v1649_v7 = vld [vmem:[#allocation3 + $0x188] sm:$0xf0]  ;;  %s1357_s14 = sshll.u32 %s1354_s29, 4  ;;  %s1358_s14 = int_to_ptr.hbm [resolvable:$true] %s1357_s14 }
  0x4f   : > { %766 = vmatpush.bf16.msrb.mxu3 %v1574_v10 }
  0x50   : > { %1043 = vmatpush.bf16.msrb.mxu0 %v1664_v32  ;;  %v1547_v32 = vld [vmem:[#allocation3 + $0xc8] sm:$0xf0] }
  0x51   : > { %1643 = vmatmul.msk.bf16.vlgmr.msra.gmra.mxu2 %vm480_vm11, %v2119_v39  ;;  %v1550_v15 = vor.u32 %v1715_v30, %v1547_v32  ;;  %v1072_v30 = vperm.slane %v1070_v26, 0 }
  0x52   : > { %661 = vmatpush.bf16.msrb.mxu1 %v1532_v13 }
  0x53   : > { %767 = vmatpush.bf16.msrb.mxu3 %v1566_v19 }
  0x54   : > { %1044 = vmatpush.bf16.msrb.mxu0 %v1656_v46  ;;  %v1589_v46 = vld [vmem:[#allocation3 + $0x118] sm:$0xf0] }
  0x55   : > { %v1592_v49 = vor.u32 %v1725_v45, %v1589_v46 }
  0x56   : > { %662 = vmatpush.bf16.msrb.mxu1 %v1524_v23 }
  0x57   : > { %768 = vmatpush.bf16.msrb.mxu3 %v1558_v27 }
  0x58   : > { %1045 = vmatpush.bf16.msrb.mxu0 %v1648_v58  ;;  %v1584_v58 = vor.u32 %v1723_v50, %v1581_v51 }
  0x5a   : > { %663 = vmatpush.bf16.msrb.mxu1 %v1516_v55 }
  0x5b   : > { %1609 = vmatmul.msk.bf16.vlgmr.msra.gmra.mxu0 %vm480_vm11, %v2125_v8  ;;  %769 = vmatpush.bf16.msrb.mxu3 %v1550_v15 }
  0x5d   : > { %1542 = vmatmul.msk.bf16.vlgmr.msrb.gmra.mxu1 %vm480_vm11, %v2115_v22  ;;  %v1668_v22 = vor.u32 %v1743_v61, %v1665_v62  ;;  %v1073_v61 = vperm.slane %v1070_v26, 1 }
  0x5e   : > { %858 = vmatpush.bf16.msra.mxu1 %v1608_v37  ;;  %1576 = vmatmul.msk.bf16.vlgmr.msrb.gmra.mxu3 %vm480_vm11, %v2103_v2  ;;  %v1652_v2 = vor.u32 %v1739_v6, %v1649_v7 }
  0x5f   : > { %964 = vmatpush.bf16.msra.mxu3 %v1642_v40 }
  0x62   : > { %859 = vmatpush.bf16.msra.mxu1 %v1600_v44 }
  0x63   : > { %965 = vmatpush.bf16.msra.mxu3 %v1634_v47 }
  0x66   : > { %860 = vmatpush.bf16.msra.mxu1 %v1592_v49 }
  0x67   : > { %966 = vmatpush.bf16.msra.mxu3 %v1626_v52 }
  0x6a   : > { %861 = vmatpush.bf16.msra.mxu1 %v1584_v58 }
  0x6b   : > { %1677 = vmatmul.msk.bf16.vlgmr.msrb.gmra.mxu0 %vm480_vm11, %v994_v43  ;;  %967 = vmatpush.bf16.msra.mxu3 %v1618_v60 }
  0x6d   : > { %1610 = vmatmul.msk.bf16.vlgmr.msra.gmra.mxu1 %vm480_vm11, %v2125_v8 }
  0x6e   : > { %1056 = vmatpush.bf16.msrb.mxu1 %v1676_v59  ;;  %1644 = vmatmul.msk.bf16.vlgmr.msra.gmra.mxu3 %vm480_vm11, %v2119_v39 }
  0x72   : > { %1057 = vmatpush.bf16.msrb.mxu1 %v1668_v22 }
  0x76   : > { %1058 = vmatpush.bf16.msrb.mxu1 %v1660_v5 }
  0x7a   : > { %1059 = vmatpush.bf16.msrb.mxu1 %v1652_v2 }
  0x7d   : > { %1678 = vmatmul.msk.bf16.vlgmr.msrb.gmra.mxu1 %vm480_vm11, %v994_v43 }
  0xb4   : > { %v563_v31 = vpop.f32.mrf.mxu2 }
  0xb8   : > { %v493_v1 = vpop.f32.mrf.mxu0 }
  0xb9   : > { %v564_v18 = vadd.f32 %v563_v31, %v493_v1 }
  0xbc   : > { %v565_v9 = vpop.f32.mrf.mxu2 }
  0xc0   : > { %v495_v0 = vpop.f32.mrf.mxu0 }
  0xc1   : > { %v566_v24 = vadd.f32 %v565_v9, %v495_v0 }
  0xc4   : > { %v757_v11 = vpop.f32.mrf.mxu2 }
  0xc8   : > { %v651_v10 = vpop.f32.mrf.mxu0 }
  0xc9   : > { %v670_v8 = vadd.f32 %v651_v10, %v564_v18  ;;  %v1122_v10 = vld [vmem:[%s2285_s4 + $0x38] sm:$0xff]  ;;  %v1116_v18 = vld [vmem:[%s2285_s4 + $0x8] sm:$0xff] }
  0xca   : > { %v507_v16 = vpop.f32.mrf.mxu1  ;;  %1135 = vmatpush.msrb.mxu2 %v1122_v10 }
  0xcb   : > { %v776_v20 = vadd.f32 %v757_v11, %v670_v8  ;;  %v1121_v11 = vld [vmem:[%s2285_s4 + $0x30] sm:$0xff]  ;;  %v1115_v8 = vld [vmem:[%s2285_s4] sm:$0xff] }
  0xcc   : > { %v759_v13 = vpop.f32.mrf.mxu2  ;;  %1136 = vmatpush.msrb.mxu2 %v1121_v11 }
  0xd0   : > { %v653_v12 = vpop.f32.mrf.mxu0 }
  0xd1   : > { %v577_v39 = vpop.f32.mrf.mxu3  ;;  %v672_v27 = vadd.f32 %v653_v12, %v566_v24  ;;  %v1120_v12 = vld [vmem:[%s2285_s4 + $0x28] sm:$0xff] }
  0xd2   : > { %v509_v23 = vpop.f32.mrf.mxu1  ;;  %v578_v48 = vadd.f32 %v577_v39, %v507_v16  ;;  %1137 = vmatpush.msrb.mxu2 %v1120_v12  ;;  %v1117_v16 = vld [vmem:[%s2285_s4 + $0x10] sm:$0xff]  ;;  %v1147_v39 = vld [vmem:[%s2287_s6] sm:$0xff] }
  0xd3   : > { %v778_v55 = vadd.f32 %v759_v13, %v672_v27  ;;  %v1119_v13 = vld [vmem:[%s2285_s4 + $0x20] sm:$0xff] }
  0xd4   : > { %v955_v21 = vpop.f32.mrf.mxu2  ;;  %1138 = vmatpush.msrb.mxu2 %v1119_v13 }
  0xd8   : > { %v849_v14 = vpop.f32.mrf.mxu0 }
  0xd9   : > { %v868_v25 = vadd.f32 %v849_v14, %v776_v20  ;;  %v579_v36 = vpop.f32.mrf.mxu3  ;;  %v1118_v14 = vld [vmem:[%s2285_s4 + $0x18] sm:$0xff]  ;;  %v1149_v20 = vld [vmem:[%s2287_s6 + $0x10] sm:$0xff] }
  0xda   : > { %v665_v35 = vpop.f32.mrf.mxu1  ;;  %v580_v52 = vadd.f32 %v579_v36, %v509_v23  ;;  %1139 = vmatpush.msrb.mxu2 %v1118_v14 }
  0xdb   : > { %v974_v29 = vadd.f32 %v955_v21, %v868_v25  ;;  %v671_v51 = vadd.f32 %v665_v35, %v578_v48  ;;  %v1148_v21 = vld [vmem:[%s2287_s6 + $0x8] sm:$0xff] }
  0xdc   : > { %v957_v17 = vpop.f32.mrf.mxu2  ;;  %1140 = vmatpush.msrb.mxu2 %v1117_v16 }
  0xde   : > { %1141 = vmatpush.msrb.mxu2 %v1116_v18  ;;  %v1269_v18 = vld [vmem:[%s2289_s8 + $0x10] sm:$0xf] }
  0xe0   : > { %v851_v19 = vpop.f32.mrf.mxu0  ;;  %1142 = vmatpush.msrb.mxu2 %v1115_v8  ;;  %v1270_v8 = vld [vmem:[%s2289_s8 + $0x18] sm:$0xf] }
  0xe1   : > { %v870_v37 = vadd.f32 %v851_v19, %v778_v55  ;;  %v771_v45 = vpop.f32.mrf.mxu3  ;;  %v1150_v19 = vld [vmem:[%s2287_s6 + $0x18] sm:$0xff] }
  0xe2   : > { %v667_v44 = vpop.f32.mrf.mxu1  ;;  %v777_v53 = vadd.f32 %v771_v45, %v671_v51  ;;  %1168 = vmatpush.msrb.mxu3 %v1150_v19  ;;  %1681 = vmatpush.msk.msra.mxu2 %vm1275_vm7, %v1269_v18  ;;  %v1267_v19 = vld [vmem:[%s2289_s8] sm:$0xff] }
  0xe3   : > { %v976_v40 = vadd.f32 %v957_v17, %v870_v37  ;;  %v673_v57 = vadd.f32 %v667_v44, %v580_v52 }
  0xe4   : > { %1169 = vmatpush.msrb.mxu3 %v1149_v20  ;;  %v1268_v20 = vld [vmem:[%s2289_s8 + $0x8] sm:$0xff]  ;;  %1297 = vmatpush.msra.mxu2 %v1267_v19 }
  0xe6   : > { %1170 = vmatpush.msrb.mxu3 %v1148_v21 }
  0xe8   : > { %v1047_v32 = vpop.f32.mrf.mxu0  ;;  %1171 = vmatpush.msrb.mxu3 %v1147_v39 }
  0xe9   : > { %v1066_v33 = vadd.f32 %v1047_v32, %v974_v29  ;;  %v773_v50 = vpop.f32.mrf.mxu3 }
  0xea   : > { %v863_v49 = vpop.f32.mrf.mxu1  ;;  %v779_v59 = vadd.f32 %v773_v50, %v673_v57  ;;  %1683 = vmatpush.msk.msra.mxu3 %vm1275_vm7, %v1270_v8 }
  0xeb   : > { %v1076_v15 = vmul.f32 %v1072_v30, %v1066_v33  ;;  %v869_v58 = vadd.f32 %v863_v49, %v777_v53 }
  0xec   : > { %1317 = vmatpush.msra.mxu3 %v1268_v20 }
  0xed   : > { %v1086_v38 = vadd.f32 %v1082_v34, %v1076_v15 }
  0xef   : > { %v2151_v41 = vmax.f32 %v1086_v38, 0.0  ;;  %v1123_v38 = vld [vmem:[%s2286_s5] sm:$0x1] }
  0xf0   : > { %v1049_v42 = vpop.f32.mrf.mxu0 }
  0xf1   : > { %v1068_v43 = vadd.f32 %v1049_v42, %v976_v40  ;;  %1096 = vrot.lane.b32.xlu0 %v2151_v41, %s1923_s25  ;;  %v969_v56 = vpop.f32.mrf.mxu3 }
  0xf2   : > { %v865_v54 = vpop.f32.mrf.mxu1  ;;  %v975_v60 = vadd.f32 %v969_v56, %v869_v58 }
  0xf3   : > { %v1078_v46 = vmul.f32 %v1072_v30, %v1068_v43  ;;  %v871_v22 = vadd.f32 %v865_v54, %v779_v59  ;;  %v1151_v43 = vld [vmem:[%s2288_s7] sm:$0x1] }
  0xf5   : > { %v1088_v47 = vadd.f32 %v1082_v34, %v1078_v46 }
  0xf7   : > { %v2155_v4 = vmax.f32 %v1088_v47, 0.0 }
  0xf9   : > { %1098 = vrot.lane.b32.xlu0 %v2155_v4, %s1923_s25  ;;  %v971_v5 = vpop.f32.mrf.mxu3 }
  0xfa   : > { %v1061_v62 = vpop.f32.mrf.mxu1  ;;  %v977_v2 = vadd.f32 %v971_v5, %v871_v22 }
  0xfb   : > { %v1067_v63 = vadd.f32 %v1061_v62, %v975_v60 }
  0xfd   : > { %v1077_v6 = vmul.f32 %v1073_v61, %v1067_v63 }
  0xff   : > { %v2159_v7 = vadd.f32 %v1083_v3, %v1077_v6 }
 0x101   : > { %v1091_v25 = vmax.f32 %v2159_v7, 0.0 }
 0x102   : > { %v1063_v1 = vpop.f32.mrf.mxu1 }
 0x103   : > { %v1069_v31 = vadd.f32 %v1063_v1, %v977_v2 }
 0x105   : > { %v1079_v0 = vmul.f32 %v1073_v61, %v1069_v31 }
 0x107   : > { %v2161_v9 = vadd.f32 %v1083_v3, %v1079_v0 }
 0x109   : > { %v1093_v28 = vmax.f32 %v2161_v9, 0.0 }
 0x163   : > { %v1097_v23 = vpop.permute.xlu0 %1096 }
 0x164   : > { %v1102_v24 = vadd.f32 %v1097_v23, %v2151_v41 }
 0x166   : > { %v1104_v27 = vadd.f32 %v1102_v24, %v1091_v25 }
 0x168   : > { %v1106_v32 = vsel %vm480_vm11, %v1104_v27, 0.0 }
 0x16b   : > { %v1099_v26 = vpop.permute.xlu0 %1098 }
 0x16c   : > { %v1103_v29 = vadd.f32 %v1099_v26, %v2155_v4 }
 0x16e   : > { %v1105_v30 = vadd.f32 %v1103_v29, %v1093_v28 }
 0x170   : > { %v1107_v55 = vsel %vm480_vm11, %v1105_v30, 0.0 }
 0x171   : > { %v1108_v33 = vadd.f32 %v1107_v55, %v1106_v32 }
 0x173   : > { %v1109_v34 = vrot.slane %v1108_v33, 4 }
 0x175   : > { %v1110_v35 = vadd.f32 %v1109_v34, %v1108_v33 }
 0x177   : > { %v1111_v36 = vrot.slane %v1110_v35, 2 }
 0x179   : > { %v1112_v37 = vadd.f32 %v1111_v36, %v1110_v35 }
 0x17b   : > { %v1113_v15 = vrot.slane %v1112_v37, 1 }
 0x17d   : > { %v1114_v17 = vadd.f32 %v1113_v15, %v1112_v37 }
 0x17f   : > { %1679 = vmatmul.msk.f32.vlgmr.msrb.gmra.mxu2 %vm480_vm11, %v1114_v17 }
 0x202   : > { %v1144_v40 = vpop.f32.mrf.mxu2 }
 0x203   : > { %v1145_v42 = vadd.f32 %v1144_v40, %v1123_v38 }
 0x205   : > { %1680 = vmatmul.msk.f32.vlgmr.msrb.gmra.mxu3 %vm1152_vm2, %v1145_v42  ;;  %vm1265_vm2 = vcmask 64512  }
 0x288   : > { %v1173_v44 = vpop.f32.mrf.mxu3 }
 0x289   : > { %v1174_v45 = vadd.f32 %v1173_v44, %v1151_v43 }
 0x28b   : > { %1177 = vrot.lane.b32.xlu1 %v1174_v45, %s1924_s17 }
 0x293   : > { %1181 = vrot.lane.b32.xlu1 %v1174_v45, %s1925_s21 }
 0x2fd   : > { %v1178_v46 = vpop.permute.xlu1 %1177 }
 0x2fe   : > { %v1180_v47 = vmax.f32 %v1174_v45, %v1178_v46 }
 0x305   : > { %v1182_v48 = vpop.permute.xlu1 %1181 }
 0x306   : > { %v1184_v49 = vmax.f32 %v1180_v47, %v1182_v48 }
 0x308   : > { %1189 = vrot.lane.b32.xlu2 %v1184_v49, %s1926_s22  ;;  %v1185_v59 = vsub.f32 %v1174_v45, %v1184_v49 }
 0x30a   : > { %v1186_v60 = vmul.f32 1.442695, %v1185_v59 }
 0x310   : > { %1195 = vrot.lane.b32.xlu2 %v1184_v49, %s1927_s23 }
 0x362   : > { %v1190_v50 = vpop.permute.xlu2 %1189 }
 0x363   : > { %v1192_v51 = vsub.f32 %v1174_v45, %v1190_v50 }
 0x365   : > { %v1193_v52 = vmul.f32 1.442695, %v1192_v51 }
 0x367   : > { %1810 = vpow2.f32 %v1193_v52 }
 0x36a   : > { %v1196_v53 = vpop.permute.xlu2 %1195 }
 0x36b   : > { %v1198_v54 = vsub.f32 %v1174_v45, %v1196_v53 }
 0x36d   : > { %v2217_v56 = vpop.eup %1810  ;;  %v1199_v57 = vmul.f32 1.442695, %v1198_v54 }
 0x36e   : > { %1202 = vrot.lane.b32.xlu0 %v2217_v56, %s1924_s17  ;;  %s1866_s17 = sshra.s32 %s1358_s14, 4  ;;  %s1867_s17 = int_to_ptr.hbm [resolvable:$true] %s1866_s17 }
 0x36f   : > { %1812 = vpow2.f32 %v1199_v57  ;;  %s1868_s13 = scalar_lea.hbm %s1867_s17, 16  ;;  %p1873_p3 = scmp.lt.s32.totalorder %s1867_s17, %s2290_s9 }
 0x370   : > { %1814 = vpow2.f32 %v1186_v60  ;;  %p1869_p0 = scmp.ne.s32.totalorder %s1867_s17, %s1868_s13  ;;  %p1874_p4 = scmp.lt.s32.totalorder %s1872_s27, %s1868_s13 }
 0x372   : > { %p1870_p1 = pnand %p1869_p0, %p2017_p5  ;;  %p1875_p7 = por %p1874_p4, %p1873_p3 }
 0x374   : > { %p1871_p2 = pneg %p1870_p1 }
 0x375   : > { %v2220_v58 = vpop.eup %1812 }
 0x376   : > { %1207 = vrot.lane.b32.xlu1 %v2220_v58, %s1925_s21  ;;  %v1815_v62 = vpop.eup %1814  ;;  %s340_s21 = sand.u32 1, %s1910_s10   ;;  %p1876_p8 = pnand %p1875_p7, %p1871_p2 }
 0x377   : > { %s1343_s16 = scalar_lea.sflag [#allocation5], %s340_s21 }
 0x3e0   : > { %v1203_v61 = vpop.permute.xlu0 %1202 }
 0x3e1   : > { %v1205_v22 = vadd.f32 %v1815_v62, %v1203_v61 }
 0x3e8   : > { %v1208_v63 = vpop.permute.xlu1 %1207 }
 0x3e9   : > { %v1210_v3 = vadd.f32 %v1208_v63, %v1205_v22 }
 0x3eb   : > { %1816 = vrcp.f32 %v1210_v3  ;;  %1245 = vrot.lane.b32.xlu0 %v1210_v3, %s1927_s23  ;;  %1227 = vrot.lane.b32.xlu2 %v1210_v3, %s1926_s22  ;;  %v1222_v1 = vand.u32 2147483648, %v1210_v3  ;;  %v1220_v0 = vand.u32 2147483647, %v1210_v3  ;;  %vm1216_vm4 = vweird.f32 %v1210_v3  ;;  %s1438_s22 = sshll.u32 %s340_s21, 4 }
 0x3ec   : > { %s342_s24 = scalar_lea.vmem [#allocation6], %s1438_s22 }
 0x3ed   : > { %v1223_v11 = vor.u32 1.1754944e-38, %v1222_v1  ;;  %vm1221_vm6 = vcmp.eq.f32.partialorder %v1220_v0, 8.507059e+37 }
 0x3f1   : > { %v1817_v5 = vpop.eup %1816 }
 0x3f2   : > { %v1212_v6 = vmul.f32 %v1817_v5, %v1210_v3  ;;  %vm1217_vm3 = vweird.f32 %v1817_v5 }
 0x3f3   : > { %vm1218_vm5 = vmor %vm1216_vm4, %vm1217_vm3  ;;  %vm1271_vm3 = vcmask 97280  }
 0x3f4   : > { %v1213_v2 = vsub.f32 1.0, %v1212_v6 }
 0x3f6   : > { %v1214_v31 = vmul.f32 %v1817_v5, %v1213_v2 }
 0x3f8   : > { %v1215_v10 = vadd.f32 %v1817_v5, %v1214_v31 }
 0x3fa   : > { %v1219_v12 = vsel %vm1218_vm5, %v1817_v5, %v1215_v10 }
 0x3fb   : > { %v1224_v13 = vsel %vm1221_vm6, %v1223_v11, %v1219_v12 }
 0x3fc   : > { %v1225_v14 = vmul.f32 %v1815_v62, %v1224_v13 }
 0x445   : > { %v1228_v16 = vpop.permute.xlu2 %1227 }
 0x446   : > { %1818 = vrcp.f32 %v1228_v16  ;;  %v1241_v29 = vand.u32 2147483648, %v1228_v16  ;;  %vm1235_vm9 = vweird.f32 %v1228_v16  ;;  %v1239_v32 = vand.u32 2147483647, %v1228_v16 }
 0x448   : > { %v1242_v34 = vor.u32 1.1754944e-38, %v1241_v29  ;;  %vm1240_vm12 = vcmp.eq.f32.partialorder %v1239_v32, 8.507059e+37 }
 0x44c   : > { %v1819_v21 = vpop.eup %1818 }
 0x44d   : > { %v1231_v23 = vmul.f32 %v1819_v21, %v1228_v16  ;;  %vm1236_vm8 = vweird.f32 %v1819_v21 }
 0x44e   : > { %vm1237_vm10 = vmor %vm1235_vm9, %vm1236_vm8 }
 0x44f   : > { %v1232_v39 = vsub.f32 1.0, %v1231_v23 }
 0x451   : > { %v1233_v26 = vmul.f32 %v1819_v21, %v1232_v39 }
 0x453   : > { %v1234_v27 = vadd.f32 %v1819_v21, %v1233_v26 }
 0x455   : > { %v1238_v33 = vsel %vm1237_vm10, %v1819_v21, %v1234_v27 }
 0x456   : > { %v1243_v37 = vsel %vm1240_vm12, %v1242_v34, %v1238_v33 }
 0x457   : > { %v1244_v40 = vmul.f32 %v2217_v56, %v1243_v37 }
 0x459   : > { %v1264_v46 = vsel %vm1263_vm1, %v1225_v14, %v1244_v40 }
 0x45d   : > { %v1246_v24 = vpop.permute.xlu0 %1245 }
 0x45e   : > { %1820 = vrcp.f32 %v1246_v24  ;;  %v1259_v36 = vand.u32 2147483648, %v1246_v24  ;;  %v1257_v17 = vand.u32 2147483647, %v1246_v24  ;;  %vm1253_vm14 = vweird.f32 %v1246_v24 }
 0x460   : > { %v1260_v42 = vor.u32 1.1754944e-38, %v1259_v36  ;;  %vm1258_vm0 = vcmp.eq.f32.partialorder %v1257_v17, 8.507059e+37 }
 0x464   : > { %v1821_v30 = vpop.eup %1820 }
 0x465   : > { %v1249_v55 = vmul.f32 %v1821_v30, %v1246_v24  ;;  %vm1254_vm13 = vweird.f32 %v1821_v30 }
 0x466   : > { %vm1255_vm15 = vmor %vm1253_vm14, %vm1254_vm13 }
 0x467   : > { %v1250_v35 = vsub.f32 1.0, %v1249_v55 }
 0x469   : > { %v1251_v15 = vmul.f32 %v1821_v30, %v1250_v35 }
 0x46b   : > { %v1252_v38 = vadd.f32 %v1821_v30, %v1251_v15 }
 0x46d   : > { %v1256_v43 = vsel %vm1255_vm15, %v1821_v30, %v1252_v38 }
 0x46e   : > { %v1261_v44 = vsel %vm1258_vm0, %v1260_v42, %v1256_v43 }
 0x46f   : > { %v1262_v45 = vmul.f32 %v2220_v58, %v1261_v44 }
 0x471   : > { %v1266_v47 = vsel %vm1265_vm2, %v1264_v46, %v1262_v45 }
 0x472   : > { %1682 = vmatmul.msk.f32.vlgmr.msra.gmra.mxu2 %vm1271_vm3, %v1266_v47  ;;  %1684 = vmatmul.msk.f32.vlgmr.msra.gmra.mxu3 %vm1271_vm3, %v1266_v47 }
 0x4f5   : > { %v1299_v48 = vpop.f32.mrf.mxu2  ;;  %v1319_v52 = vpop.f32.mrf.mxu3 }
 0x4f6   : > { %v1322_v49 = vperm.slane %v1299_v48, 0  ;;  %v1323_v53 = vperm.slane %v1319_v52, 0 }
 0x4f8   : > { %v1324_v50 = vmul.f32 %v1322_v49, %v2151_v41  ;;  %v1326_v51 = vmul.f32 %v1322_v49, %v2155_v4  ;;  %v1327_v56 = vmul.f32 %v1323_v53, %v1093_v28  ;;  %v1325_v4 = vmul.f32 %v1323_v53, %v1091_v25 }
 0x4fa   : > { %1332 = vrot.lane.b32.xlu2 %v1326_v51, %s1923_s25  ;;  %1330 = vrot.lane.b32.xlu1 %v1324_v50, %s1923_s25  ;;  %s1355_s25 = sshll.u32 %s342_s24, 4  ;;  %s1356_s25 = int_to_ptr.vmem [resolvable:$true] %s1355_s25 }
 0x554   : > { %v1333_v54 = vpop.permute.xlu2 %1332 }
 0x555   : > { %v1337_v57 = vadd.f32 %v1333_v54, %v1326_v51 }
 0x557   : > { %v1339_v58 = vadd.f32 %v1337_v57, %v1327_v56 }
 0x559   : > { %1341 = vst.msk [vmem:[%s342_s24 + $0x8] sm:$0xff] %vm480_vm11, %v1339_v58 }
 0x56c   : > { %v1331_v41 = vpop.permute.xlu1 %1330 }
 0x56d   : > { %v1336_v59 = vadd.f32 %v1331_v41, %v1324_v50 }
 0x56f   : > { %v1338_v9 = vadd.f32 %v1336_v59, %v1325_v4 }
 0x571   : > { %1340 = vst.msk [vmem:[%s342_s24] sm:$0xff] %vm480_vm11, %v1338_v9 }
 0x572   : > { %1879 = shalt.err (!%p1876_p8)
}
 0x573   : > { %s1928_s21 = smov 128  }
 0x574   : > { %1756 = dma.vmem_to_hbm [thread:$0]  (%p2017_p5), %s1356_s25, 256, %s1358_s14, %s1343_s16, %s1928_s21, %s1928_s21, %s1927_s23  }
 0x575 PF: > { %p1768_p9 = scmp.ge.s32.totalorder %s1918_s12, 2  ;;  %s1372_s24 = sand.u32 1, %s1906_s30  }
 0x576   : > { %s1373_s22 = scalar_lea.sflag [#allocation5], %s1372_s24 }
 0x577   : > { %p1763_p10 = pnand %p1768_p9, %p2021_p6 }
 0x579   : > { %p1764_p11 = pneg %p1763_p10 }
 0x57b   : > { %1901 = dma.done.wait (%p1764_p11), %s1373_s22, 256  }
 0x57c   : > { %1903 = vsyncadd (%p1764_p11), %s1373_s22, 4294967040  ;;  %p20_p12 = scmp.ge.s32.totalorder %s2004_s15, 4   ;;  %s2301_s30 = smov %s1910_s10 }
 0x57d   : > { %s2302_s10 = smov %s1914_s11  ;;  %s2303_s11 = smov %s2015_s18 }
 0x57e   : > { %s2304_s12 = smov %s2004_s15  ;;  %22 = sbr.rel (!%p20_p12) target bundleno = 4 (0x4), region = 102 }
 0x583   :  { %1379 = vsyncpa [#allocation4], 1 }
 0x584   :  { %1381 = vsyncpa [#allocation4 + $0x1], 1 }
 0x585   :  { %1382 = vsyncpa [#allocation5], 1 }
 0x586   :  { %1384 = vsyncpa [#allocation5 + $0x1], 1 }

</bundles_post_ra>
